<compile_context>
chip_gen: v6e
topology: v6e:2x2x1
jax: 0.10.0
libtpu: 0.0.40
codegen_flags: <defaults>
</compile_context>

<pallas_src>
import functools

import jax
import jax.numpy as jnp
from jax import lax
from jax.experimental import pallas as pl
from jax.experimental.pallas import tpu as pltpu


# --------------------------------------------------------------------------------------
# Kernel
# --------------------------------------------------------------------------------------
def _connector_kernel(x_ref, wcomb_ref, bcomb_ref, rel_ref, out_ref, projn_ref,
                      *, tb, tm, seq_len, ep):
    # Grid: (batch-tile index b ["parallel"], row-tile index r ["arbitrary"]).
    #
    # projn_ref holds [proj | null] (tb, L, Ep+1), computed once per batch tile at
    # r == 0 and reused by every row tile of the same batch tile.  This is only
    # correct because r is the innermost grid axis and sequential ("arbitrary");
    # do NOT reorder the grid or mark the r axis "parallel".
    r = pl.program_id(1)
    single_row_tile = (tm == seq_len)

    @pl.when(r == 0)
    def _project():
        w = wcomb_ref[...]                                # (Ep, Ep+1) compute dtype
        b = bcomb_ref[...]                                # (1, Ep+1)  f32

        def project_one(t, carry):
            p = jnp.dot(x_ref[t], w, preferred_element_type=jnp.float32) + b
            projn_ref[t] = p.astype(projn_ref.dtype)      # (L, Ep+1)
            return carry

        if tb <= 2:
            for t in range(tb):
                project_one(t, 0)
        else:
            lax.fori_loop(0, tb, project_one, 0)

    rel = rel_ref[...].astype(jnp.float32)                # (tm, L)
    ii = lax.broadcasted_iota(jnp.int32, (tm, seq_len), 0)
    if not single_row_tile:
        ii = ii + r * tm                                  # global row index
    jj = lax.broadcasted_iota(jnp.int32, (tm, seq_len), 1)
    diag = ii == jj
    row_start = 0 if single_row_tile else pl.multiple_of(r * tm, tm)

    def emit_one(t, carry):
        proj_full = projn_ref[t, :, :ep]                  # (L, Ep)  keys
        if single_row_tile:
            proj_rows = proj_full                         # (L, Ep)  queries
            null_rows = projn_ref[t, :, ep:ep + 1]        # (L, 1)
        else:
            proj_rows = projn_ref[t, pl.ds(row_start, tm), :ep]          # (tm, Ep)
            null_rows = projn_ref[t, pl.ds(row_start, tm), ep:ep + 1]    # (tm, 1)

        # position_scores = proj_rows @ proj_full^T without materializing a transpose:
        # contract both operands on their last (lane) dim.
        scores = lax.dot_general(
            proj_rows, proj_full,
            dimension_numbers=(((1,), (1,)), ((), ())),
            preferred_element_type=jnp.float32)           # (tm, L) f32
        scores = scores + rel
        scores = jnp.where(diag, jnp.float32(0.0), scores)  # zero the diagonal

        # struct_logits block = [null | scores]  -> single lane-dense store, no extra
        # XLA concat pass over the (B, L, L+1) tensor.
        block = jnp.concatenate([null_rows.astype(jnp.float32), scores], axis=-1)
        out_ref[t] = block.astype(out_ref.dtype)          # (tm, L+1)
        return carry

    if tb <= 2:
        for t in range(tb):
            emit_one(t, 0)
    else:
        lax.fori_loop(0, tb, emit_one, 0)


# --------------------------------------------------------------------------------------
# VMEM-budget-aware tiling
# --------------------------------------------------------------------------------------
def _lane_pad(n):
    return ((n + 127) // 128) * 128


def _sub_pad(n, s):
    return ((n + s - 1) // s) * s


def _vmem_capacity_bytes():
    try:
        fn = getattr(pltpu, "get_tpu_info", None)
        if fn is not None:
            cap = getattr(fn(), "vmem_capacity_bytes", None)
            if cap:
                return int(cap)
    except Exception:
        pass
    return 64 * 1024 * 1024  # conservative fallback (v7x per-TensorCore VMEM)


def _vmem_need_bytes(tb, tm, L, Ep, cs, rel_s, sub):
    rel_sub = 8 if rel_s == 4 else 16
    x_blk = 2 * tb * _sub_pad(L, sub) * _lane_pad(Ep) * cs              # double-buffered
    w_blk = 2 * _sub_pad(Ep, sub) * _lane_pad(Ep + 1) * cs
    b_blk = 2 * 8 * _lane_pad(Ep + 1) * 4
    rel_blk = 2 * _sub_pad(tm, rel_sub) * _lane_pad(L) * rel_s
    out_blk = 2 * tb * _sub_pad(tm, 8) * _lane_pad(L + 1) * 4
    scratch = tb * _sub_pad(L, sub) * _lane_pad(Ep + 1) * cs            # proj|null cache
    return x_blk + w_blk + b_blk + rel_blk + out_blk + scratch


def _pick_tiles(B, L, Ep, cs, rel_s, capacity):
    sub = 8 if cs == 4 else 16
    budget = (capacity * 3) // 4          # leave headroom for compiler-internal scratch
    tb_cands = [c for c in (8, 4, 2, 1) if B % c == 0]
    if B >= 2:
        # Keep >= 2 batch tiles so the 'parallel' b axis feeds both v7x TensorCores.
        halved = [c for c in tb_cands if c <= B // 2]
        if halved:
            tb_cands = halved
    tm_all = sorted({d for d in range(sub, L + 1, sub) if L % d == 0} | {L}, reverse=True)
    tm_cands = [t for t in tm_all if t <= 512] or [min(tm_all)]
    for tb in tb_cands:                   # prefer big batch tiles, then biggest row tile
        for tm in tm_cands:
            if _vmem_need_bytes(tb, tm, L, Ep, cs, rel_s, sub) <= budget:
                return tb, tm
    return tb_cands[-1], tm_cands[-1]


# --------------------------------------------------------------------------------------
# Public wrapper
# --------------------------------------------------------------------------------------
def rna_2d_structure_connector(x, w_proj, b_proj, rel_emb_table, w_null, b_null,
                               max_rel_pos=20, *, compute_dtype=jnp.bfloat16,
                               out_dtype=jnp.float32, batch_tile=None, row_tile=None,
                               vmem_limit_bytes=None, k_pad_multiple=128):
    """x: (B, L, E).  PyTorch Linear convention: w_proj (E, E), b_proj (E,),
    rel_emb_table (max_rel_pos+1, 1), w_null (1, E), b_null (1,).

    Returns struct_logits (B, L, L+1) = cat([null_scores, position_scores], -1).
    compute_dtype=bfloat16 (default) runs the matmuls on the bf16 MXU path with f32
    accumulation; null/proj/rel then carry bf16 rounding (loose-tolerance match).
    Use compute_dtype=float32 for a near-exact match with the PyTorch reference.
    """
    B, L, E = x.shape
    cdt = jnp.dtype(compute_dtype)
    cs = cdt.itemsize
    sub = 8 if cs == 4 else 16

    # ---- parameter-only glue (tiny, done once in XLA) --------------------------------
    pos = jnp.arange(L)
    rel_idx = jnp.clip(jnp.abs(pos[:, None] - pos[None, :]), 0, max_rel_pos)
    rel_dtype = jnp.float32 if cdt == jnp.dtype(jnp.float32) else jnp.bfloat16
    rel_bias = jnp.take(rel_emb_table[:, 0].astype(jnp.float32), rel_idx,
                        axis=0).astype(rel_dtype)                       # (L, L)

    # Zero-pad E up to a lane multiple (exact: padded rows/cols are zeros).
    # k_pad_multiple=256 can improve MXU tiling regularity on v6e/v7x.
    km = max(128, int(k_pad_multiple))
    Ep = ((E + km - 1) // km) * km
    pe = Ep - E

    # Fused weight: columns [0, Ep) are the shared projection, column Ep is the null head.
    wp = jnp.pad(w_proj.T.astype(jnp.float32), ((0, pe), (0, pe)))      # (Ep, Ep)
    wn = jnp.pad(w_null.T.astype(jnp.float32), ((0, pe), (0, 0)))       # (Ep, 1)
    wcomb = jnp.concatenate([wp, wn], axis=1).astype(compute_dtype)     # (Ep, Ep+1)
    bcomb = jnp.concatenate(
        [jnp.pad(b_proj.astype(jnp.float32), (0, pe)),
         b_null.reshape(1).astype(jnp.float32)]).reshape(1, Ep + 1)     # f32
    xk = jnp.pad(x.astype(jnp.float32),
                 ((0, 0), (0, 0), (0, pe))).astype(compute_dtype)       # (B, L, Ep)

    # ---- VMEM-budget-aware tiling + scoped-VMEM limit ---------------------------------
    capacity = _vmem_capacity_bytes()
    rel_s = jnp.dtype(rel_dtype).itemsize
    tb, tm = _pick_tiles(B, L, Ep, cs, rel_s, capacity)
    if batch_tile is not None:
        tb = int(batch_tile)
    if row_tile is not None:
        tm = int(row_tile)
    assert B % tb == 0, (B, tb)
    assert L % tm == 0, (L, tm)
    if tm != L:
        # bf16 refs are (16, 128)-tiled: row slices need 16-alignment (8 for f32).
        assert tm % sub == 0, (tm, sub, str(cdt))

    need = _vmem_need_bytes(tb, tm, L, Ep, cs, rel_s, sub)
    if vmem_limit_bytes is None:
        vmem_limit_bytes = min(capacity * 9 // 10, max(need * 3 // 2, 32 << 20))
    vmem_limit_bytes = int(max(int(vmem_limit_bytes), need))

    grid = (B // tb, L // tm)
    kernel = functools.partial(_connector_kernel, tb=tb, tm=tm, seq_len=L, ep=Ep)

    struct_logits = pl.pallas_call(
        kernel,
        out_shape=jax.ShapeDtypeStruct((B, L, L + 1), out_dtype),
        grid_spec=pltpu.PrefetchScalarGridSpec(
            num_scalar_prefetch=0,
            grid=grid,
            in_specs=[
                pl.BlockSpec((tb, L, Ep), lambda b, r: (b, 0, 0)),     # x (resident over r)
                pl.BlockSpec((Ep, Ep + 1), lambda b, r: (0, 0)),       # fused proj|null weight
                pl.BlockSpec((1, Ep + 1), lambda b, r: (0, 0)),        # fused bias (f32)
                pl.BlockSpec((tm, L), lambda b, r: (r, 0)),            # rel-bias row tile
            ],
            out_specs=pl.BlockSpec((tb, tm, L + 1), lambda b, r: (b, r, 0)),
            scratch_shapes=[pltpu.VMEM((tb, L, Ep + 1), compute_dtype)],  # proj|null cache
        ),
        # b axis: independent -> "parallel" (megacore).  r axis MUST stay "arbitrary"
        # (sequential, innermost): the proj scratch is filled at r == 0 and reused.
        compiler_params=pltpu.CompilerParams(
            dimension_semantics=("parallel", "arbitrary"),
            vmem_limit_bytes=vmem_limit_bytes),
    )(xk, wcomb, bcomb, rel_bias)

    return struct_logits


# --------------------------------------------------------------------------------------
# Pure-JAX reference + self-test
# --------------------------------------------------------------------------------------
def _reference(x, w_proj, b_proj, rel_emb_table, w_null, b_null, max_rel_pos=20):
    B, L, E = x.shape
    proj = x @ w_proj.T + b_proj
    scores = jnp.einsum('ble,bke->blk', proj, proj)
    pos = jnp.arange(L)
    rel = jnp.clip(jnp.abs(pos[:, None] - pos[None, :]), 0, max_rel_pos)
    scores = scores + rel_emb_table[rel, 0]
    eye = jnp.eye(L, dtype=bool)
    scores = jnp.where(eye[None], 0.0, scores)
    null = x @ w_null.T + b_null
    return jnp.concatenate([null, scores], axis=-1)


if __name__ == "__main__":
    B, L, E = 2, 8, 32
    MAX_REL_POS = 20

    key = jax.random.PRNGKey(0)
    k = jax.random.split(key, 6)
    x = jax.random.normal(k[0], (B, L, E), dtype=jnp.float32)
    w_proj = jax.random.normal(k[1], (E, E), dtype=jnp.float32) * (1.0 / jnp.sqrt(E))
    b_proj = jax.random.normal(k[2], (E,), dtype=jnp.float32) * 0.01
    rel_emb = jax.random.normal(k[3], (MAX_REL_POS + 1, 1), dtype=jnp.float32)
    w_null = jax.random.normal(k[4], (1, E), dtype=jnp.float32) * (1.0 / jnp.sqrt(E))
    b_null = jax.random.normal(k[5], (1,), dtype=jnp.float32) * 0.01

    ref = _reference(x, w_proj, b_proj, rel_emb, w_null, b_null,
                     max_rel_pos=MAX_REL_POS)

    # f32 compute path: tight tolerance vs reference.
    out_f32 = rna_2d_structure_connector(x, w_proj, b_proj, rel_emb, w_null, b_null,
                                         max_rel_pos=MAX_REL_POS,
                                         compute_dtype=jnp.float32)
    out_f32 = jax.block_until_ready(out_f32)
    assert out_f32.shape == (B, L, L + 1), out_f32.shape
    assert jnp.allclose(out_f32, ref, atol=1e-4, rtol=1e-4), "f32 mismatch vs reference"

    # Default bf16 MXU path (f32 accumulation): loose tolerance sanity check.
    out_bf16 = rna_2d_structure_connector(x, w_proj, b_proj, rel_emb, w_null, b_null,
                                          max_rel_pos=MAX_REL_POS)
    out_bf16 = jax.block_until_ready(out_bf16)
    assert out_bf16.shape == (B, L, L + 1), out_bf16.shape
    assert jnp.allclose(out_bf16, ref, atol=5e-1, rtol=5e-2), "bf16 mismatch vs reference"

    print("KERNEL_OK")
</pallas_src>

<mosaic_0001>
module attributes {stable_mosaic.version = 11 : i64} {
  func.func @_connector_kernel(%arg0: i32, %arg1: i32, %arg2: memref<1x8x128xf32, #tpu.memory_space<vmem>>, %arg3: memref<128x129xf32, #tpu.memory_space<vmem>>, %arg4: memref<1x129xf32, #tpu.memory_space<vmem>>, %arg5: memref<8x8xf32, #tpu.memory_space<vmem>>, %arg6: memref<1x8x9xf32, #tpu.memory_space<vmem>>, %arg7: memref<1x8x129xf32, #tpu.memory_space<vmem>>) attributes {dimension_semantics = [#tpu.dimension_semantics<parallel>, #tpu.dimension_semantics<arbitrary>], iteration_bounds = array<i64: 2, 1>, scalar_prefetch = 0 : i64, scratch_operands = 1 : i64, tpu.core_type = #tpu.core_type<tc>, window_params = [{transform_indices = @transform_0, window_bounds = array<i64: 1, 8, 128>}, {pipeline_mode = #tpu.pipeline_mode<synchronous>, transform_indices = @transform_1, window_bounds = array<i64: 128, 129>}, {pipeline_mode = #tpu.pipeline_mode<synchronous>, transform_indices = @transform_2, window_bounds = array<i64: 1, 129>}, {transform_indices = @transform_3, window_bounds = array<i64: 8, 8>}, {transform_indices = @transform_4, window_bounds = array<i64: 1, 8, 9>}]} {
    %c0_i32 = arith.constant 0 : i32
    %0 = arith.cmpi eq, %arg1, %c0_i32 : i32
    %1 = arith.extui %0 : i1 to i32
    %c0_i32_0 = arith.constant 0 : i32
    %2 = arith.cmpi ne, %1, %c0_i32_0 : i32
    scf.if %2 {
      %c0_11 = arith.constant 0 : index
      %c0_12 = arith.constant 0 : index
      %19 = vector.load %arg3[%c0_11, %c0_12] : memref<128x129xf32, #tpu.memory_space<vmem>>, vector<128x129xf32>
      %c0_13 = arith.constant 0 : index
      %c0_14 = arith.constant 0 : index
      %20 = vector.load %arg4[%c0_13, %c0_14] : memref<1x129xf32, #tpu.memory_space<vmem>>, vector<1x129xf32>
      %c0_15 = arith.constant 0 : index
      %c0_16 = arith.constant 0 : index
      %c0_17 = arith.constant 0 : index
      %21 = vector.load %arg2[%c0_15, %c0_16, %c0_17] : memref<1x8x128xf32, #tpu.memory_space<vmem>>, vector<1x8x128xf32>
      %22 = vector.shape_cast %21 : vector<1x8x128xf32> to vector<8x128xf32>
      %cst_18 = arith.constant dense<0.000000e+00> : vector<8x129xf32>
      %23 = tpu.matmul %22, %19, %cst_18 {dimension_numbers = #tpu.dot_dimension_numbers<[1], [0], [0], [1], [0, 0, 1, 1], [], []>} : vector<8x128xf32>, vector<128x129xf32>, vector<8x129xf32> -> vector<8x129xf32>
      %24 = vector.broadcast %20 : vector<1x129xf32> to vector<8x129xf32>
      %25 = arith.addf %23, %24 : vector<8x129xf32>
      %c0_19 = arith.constant 0 : index
      %c0_20 = arith.constant 0 : index
      %c0_21 = arith.constant 0 : index
      %26 = vector.load %arg7[%c0_19, %c0_20, %c0_21] : memref<1x8x129xf32, #tpu.memory_space<vmem>>, vector<1x8x129xf32>
      %27 = vector.shape_cast %26 : vector<1x8x129xf32> to vector<8x129xf32>
      %28 = vector.shape_cast %25 : vector<8x129xf32> to vector<1x8x129xf32>
      tpu.vector_store %arg7[%c0_19, %c0_20, %c0_21], %28 {strides = array<i32>} : memref<1x8x129xf32, #tpu.memory_space<vmem>>, vector<1x8x129xf32>,
    } else {
    }
    %c0 = arith.constant 0 : index
    %c0_1 = arith.constant 0 : index
    %3 = vector.load %arg5[%c0, %c0_1] : memref<8x8xf32, #tpu.memory_space<vmem>>, vector<8x8xf32>
    %4 = tpu.iota {dimensions = array<i32: 0>} : vector<8x8xi32>
    %5 = tpu.iota {dimensions = array<i32: 1>} : vector<8x8xi32>
    %6 = arith.cmpi eq, %4, %5 : vector<8x8xi32>
    %c0_2 = arith.constant 0 : index
    %c0_3 = arith.constant 0 : index
    %c0_4 = arith.constant 0 : index
    %7 = vector.load %arg7[%c0_2, %c0_3, %c0_4] : memref<1x8x129xf32, #tpu.memory_space<vmem>>, vector<1x8x128xf32>
    %8 = vector.shape_cast %7 : vector<1x8x128xf32> to vector<8x128xf32>
    %c0_5 = arith.constant 0 : index
    %c0_6 = arith.constant 0 : index
    %c128 = arith.constant 128 : index
    %9 = vector.load %arg7[%c0_5, %c0_6, %c128] : memref<1x8x129xf32, #tpu.memory_space<vmem>>, vector<1x8x1xf32>
    %10 = vector.shape_cast %9 : vector<1x8x1xf32> to vector<8x1xf32>
    %cst = arith.constant dense<0.000000e+00> : vector<8x8xf32>
    %11 = tpu.matmul %8, %8, %cst {dimension_numbers = #tpu.dot_dimension_numbers<[1], [1], [0], [0], [0, 0, 1, 0], [], []>} : vector<8x128xf32>, vector<8x128xf32>, vector<8x8xf32> -> vector<8x8xf32>
    %12 = arith.addf %11, %3 : vector<8x8xf32>
    %cst_7 = arith.constant 0.000000e+00 : f32
    %13 = vector.broadcast %cst_7 : f32 to vector<8x8xf32>
    %14 = arith.select %6, %13, %12 : vector<8x8xi1>, vector<8x8xf32>
    %15 = tpu.concatenate %10, %14 in 1 : vector<8x1xf32>, vector<8x8xf32> -> vector<8x9xf32>
    %c0_8 = arith.constant 0 : index
    %c0_9 = arith.constant 0 : index
    %c0_10 = arith.constant 0 : index
    %16 = vector.load %arg6[%c0_8, %c0_9, %c0_10] : memref<1x8x9xf32, #tpu.memory_space<vmem>>, vector<1x8x9xf32>
    %17 = vector.shape_cast %16 : vector<1x8x9xf32> to vector<8x9xf32>
    %18 = vector.shape_cast %15 : vector<8x9xf32> to vector<1x8x9xf32>
    tpu.vector_store %arg6[%c0_8, %c0_9, %c0_10], %18 {strides = array<i32>} : memref<1x8x9xf32, #tpu.memory_space<vmem>>, vector<1x8x9xf32>,
    return
  }
  func.func @transform_0(%arg0: i32, %arg1: i32) -> (i32, i32, i32) {
    %c0_i32 = arith.constant 0 : i32
    %c0_i32_0 = arith.constant 0 : i32
    %c0_i32_1 = arith.constant 0 : i32
    return %arg0, %c0_i32, %c0_i32_0 : i32, i32, i32
  }
  func.func @transform_1(%arg0: i32, %arg1: i32) -> (i32, i32) {
    %c0_i32 = arith.constant 0 : i32
    %c0_i32_0 = arith.constant 0 : i32
    %c0_i32_1 = arith.constant 0 : i32
    return %c0_i32, %c0_i32_0 : i32, i32
  }
  func.func @transform_2(%arg0: i32, %arg1: i32) -> (i32, i32) {
    %c0_i32 = arith.constant 0 : i32
    %c0_i32_0 = arith.constant 0 : i32
    %c0_i32_1 = arith.constant 0 : i32
    return %c0_i32, %c0_i32_0 : i32, i32
  }
  func.func @transform_3(%arg0: i32, %arg1: i32) -> (i32, i32) {
    %c0_i32 = arith.constant 0 : i32
    %c0_i32_0 = arith.constant 0 : i32
    return %arg1, %c0_i32 : i32, i32
  }
  func.func @transform_4(%arg0: i32, %arg1: i32) -> (i32, i32, i32) {
    %c0_i32 = arith.constant 0 : i32
    %c0_i32_0 = arith.constant 0 : i32
    return %arg0, %arg1, %c0_i32 : i32, i32, i32
  }
}

</mosaic_0001>

<bundles_post_ra>
// kernel: tpu_custom_call.1
= control target key start
LH: loop header
LB: loop body
LE: loop exit
PB: predicated region body
PF: predicated region fallthrough
CT: control target
= control target key end

     0   :  { %9 = vsyncpa [#allocation4], 0  ;;  %s928_s0 = inlined_call_operand.vmem [shape: f32[2,8,128], index: 0, kind: input, shape index: {}]   ;;  %s929_s1 = inlined_call_operand.vmem [shape: f32[128,129], index: 1, kind: input, shape index: {}]   ;;  %s930_s2 = inlined_call_operand.vmem [shape: f32[1,129], index: 2, kind: input, shape index: {}]   ;;  %s931_s3 = inlined_call_operand.vmem [shape: f32[8,8], index: 3, kind: input, shape index: {}]   ;;  %s932_s4 = inlined_call_operand.hbm [shape: f32[2,8,9], index: 4, kind: output, shape index: {}]  }
   0x1   :  { %11 = vsyncpa [#allocation4 + $0x1], 0  ;;  %s716_s15 = smov 0   ;;  %s718_s16 = smov 0  }
   0x2   :  { %s720_s17 = smov 0   ;;  %s722_s18 = smov 0  }
   0x3   :  { %s724_s19 = smov 0   ;;  %s726_s20 = smov 0  }
   0x4 LB: > { %s532_s21 = sadd.s32 4294967295, %s685_s20   ;;  %s533_s22 = sadd.s32 4294967294, %s685_s20   ;;  %s685_s20 = sphi %s726_s20, %s17_s20   ;;  %s681_s19 = sphi %s724_s19, %s939_s19   ;;  %s677_s18 = sphi %s722_s18, %s938_s18   ;;  %s673_s17 = sphi %s720_s17, %s937_s17   ;;  %s669_s16 = sphi %s718_s16, %s936_s16   ;;  %s665_s15 = sphi %s716_s15, %s935_s15  }
   0x5   : > { %s29_s23 = sadd.s32 1, %s681_s19  ;;  %s132_s24 = sadd.s32 1, %s673_s17 }
   0x6   : > { %p31_p0 = scmp.ge.s32.totalorder %s29_s23, 2  ;;  %p142_p1 = scmp.ne.s32.totalorder %s673_s17, %s669_s16 }
   0x7   : > { %p143_p2 = scmp.eq.s32.totalorder %s532_s21, 1  ;;  %p148_p3 = scmp.ne.s32.totalorder %s669_s16, %s665_s15 }
   0x8   : > { %s941_s23 = smov (%p31_p0, %s29_s23), 0  ;;  %p149_p5 = scmp.eq.s32.totalorder %s533_s22, 1 }
   0x9   : > { %p756_p4 = por %p143_p2, %p142_p1  ;;  %s127_s26 = ssub.s32 %s681_s19, %s941_s23 }
   0xa   : > { %p537_p6 = scmp.ge.s32.totalorder %s685_s20, 1  ;;  %p130_p7 = scmp.eq.s32.totalorder %s127_s26, 0 }
   0xb   : > { %p763_p8 = por %p149_p5, %p148_p3  ;;  %p187_p9 = scmp.lt.s32.totalorder %s685_s20, 3 }
   0xc   : > { %s769_s28 = scalar_select %p130_p7, %s673_s17, %s132_s24  }
   0xd   : > { %p188_p10 = pnand %p537_p6, %p187_p9 }
   0xe   : > { %p216_p11 = scmp.lt.s32.totalorder (!%p188_p10), %s677_s18, 1  ;;  %s689_s12 = smov (!%p188_p10), 1  }
   0xf   : > { %191 = sbr.rel (%p188_p10) target bundleno = 576 (0x240), region = 36  ;;  %s213_s13 = sand.u32 (!%p188_p10), 1, %s669_s16  }
  0x10   : > { %s538_s14 = sshll.u32 (!%p188_p10), %s213_s13, 3  ;;  %s541_s21 = sshll.u32 (!%p188_p10), %s677_s18, 7 }
  0x11   : > { %s215_s22 = scalar_lea.vmem (!%p188_p10), [#allocation3], %s538_s14  ;;  %s435_s5 = scalar_lea.sflag (!%p188_p10), [#allocation4], %s213_s13 }
  0x12   : > { %s449_s26 = sshll.u32 (!%p188_p10), %s215_s22, 4  ;;  %s450_s26 = int_to_ptr.vmem [resolvable:$true] %s449_s26 }
  0x13   : > { %s609_s6 = scalar_lea.vmem (!%p188_p10), %s450_s26, 128 }
  0x14   : > { %v259_v0 = vld [vmem:[%s929_s1 + $0xf8] sm:$0xff]  ;;  %v258_v1 = vld [vmem:[%s929_s1 + $0xf0] sm:$0xff]  ;;  %v257_v2 = vld [vmem:[%s929_s1 + $0xe8] sm:$0xff]  ;;  %v687_v4 = vmov 0.0   ;;  %s217_s24 = scalar_select %p216_p11, %s677_s18, 1  ;;  %vm688_vm0 = vmmov 0   ;;  %v263_v34 = vlaneseq }
  0x15   : > { %273 = vmatprep.subr.mxu0 %v259_v0  ;;  %v256_v3 = vld [vmem:[%s929_s1 + $0xe0] sm:$0xff]  ;;  %337 = vmatprep.mubr.f32.mxu0 %v687_v4  ;;  %v255_v5 = vld [vmem:[%s929_s1 + $0xd8] sm:$0xff]  ;;  %v254_v6 = vld [vmem:[%s929_s1 + $0xd0] sm:$0xff]  ;;  %vm345_vm1 = vcmask 7168   ;;  %vm432_vm3 = vcmask 72704   ;;  %p610_p12 = scmp.ne.s32.totalorder %s450_s26, %s609_s6  ;;  %s690_s18 = smov [#allocation3]  }
  0x16   : > { %274 = vmatpush1.msra.mxu0 %v258_v1  ;;  %546 = vmatprep.subr.mxu1 %v687_v4  ;;  %v253_v7 = vld [vmem:[%s929_s1 + $0xc8] sm:$0xff]  ;;  %v252_v8 = vld [vmem:[%s929_s1 + $0xc0] sm:$0xff]  ;;  %v251_v9 = vld [vmem:[%s929_s1 + $0xb8] sm:$0xff]  ;;  %s539_s10 = sshll.u32 %s217_s24, 3  ;;  %v264_v35 = vshrl.u32 %v263_v34, 7  ;;  %v351_v45 = vand.u32 127, %v263_v34  ;;  %s887_s24 = scalar_lea.hbm %s932_s4, %s541_s21 }
  0x17   : > { %275 = vmatprep.subr.mxu0 %v257_v2  ;;  %v250_v10 = vld [vmem:[%s929_s1 + $0xb0] sm:$0xff]  ;;  %v249_v11 = vld [vmem:[%s929_s1 + $0xa8] sm:$0xff]  ;;  %v248_v12 = vld [vmem:[%s929_s1 + $0xa0] sm:$0xff]  ;;  %s219_s30 = scalar_lea.vmem %s928_s0, %s539_s10  ;;  %548 = vmatprep.mubr.msk.f32.mxu1 %vm688_vm0, %v687_v4  ;;  %p611_p13 = pnand %p610_p12, %p756_p4 }
  0x18   : > { %276 = vmatpush1.msra.mxu0 %v256_v3  ;;  %v247_v13 = vld [vmem:[%s929_s1 + $0x98] sm:$0xff]  ;;  %v246_v14 = vld [vmem:[%s929_s1 + $0x90] sm:$0xff]  ;;  %v245_v15 = vld [vmem:[%s929_s1 + $0x88] sm:$0xff]  ;;  %v265_v36 = vsub.s32 0, %v264_v35  ;;  %v269_v38 = vsub.s32 1, %v264_v35  ;;  %vm352_vm2 = vcmp.eq.s32.totalorder %v264_v35, %v351_v45  ;;  %s613_s7 = sshll.u32 %s690_s18, 4  ;;  %s614_s7 = int_to_ptr.vmem [resolvable:$false] %s613_s7 }
  0x19   : > { %277 = vmatprep.subr.mxu0 %v255_v5  ;;  %v244_v16 = vld [vmem:[%s929_s1 + $0x80] sm:$0xff]  ;;  %v243_v17 = vld [vmem:[%s929_s1 + $0x78] sm:$0xff]  ;;  %v242_v18 = vld [vmem:[%s929_s1 + $0x70] sm:$0xff]  ;;  %p612_p0 = pneg %p611_p13  ;;  %s615_s8 = scalar_lea.vmem %s614_s7, 256 }
  0x1a   : > { %278 = vmatpush1.msra.mxu0 %v254_v6  ;;  %v241_v19 = vld [vmem:[%s929_s1 + $0x68] sm:$0xff]  ;;  %v240_v20 = vld [vmem:[%s929_s1 + $0x60] sm:$0xff]  ;;  %v239_v21 = vld [vmem:[%s929_s1 + $0x58] sm:$0xff]  ;;  %p616_p1 = scmp.lt.s32.totalorder %s450_s26, %s614_s7  ;;  %p617_p2 = scmp.lt.s32.totalorder %s615_s8, %s609_s6 }
  0x1b   : > { %279 = vmatprep.subr.mxu0 %v253_v7  ;;  %v238_v22 = vld [vmem:[%s929_s1 + $0x50] sm:$0xff]  ;;  %v237_v23 = vld [vmem:[%s929_s1 + $0x48] sm:$0xff]  ;;  %v236_v24 = vld [vmem:[%s929_s1 + $0x40] sm:$0xff] }
  0x1c   : > { %280 = vmatpush1.msra.mxu0 %v252_v8  ;;  %v235_v25 = vld [vmem:[%s929_s1 + $0x38] sm:$0xff]  ;;  %v234_v26 = vld [vmem:[%s929_s1 + $0x30] sm:$0xff]  ;;  %v233_v27 = vld [vmem:[%s929_s1 + $0x28] sm:$0xff]  ;;  %p618_p3 = por %p617_p2, %p616_p1 }
  0x1d   : > { %281 = vmatprep.subr.mxu0 %v251_v9  ;;  %v232_v28 = vld [vmem:[%s929_s1 + $0x20] sm:$0xff]  ;;  %v231_v29 = vld [vmem:[%s929_s1 + $0x18] sm:$0xff]  ;;  %v230_v30 = vld [vmem:[%s929_s1 + $0x10] sm:$0xff] }
  0x1e   : > { %282 = vmatpush1.msra.mxu0 %v250_v10  ;;  %v229_v31 = vld [vmem:[%s929_s1 + $0x8] sm:$0xff]  ;;  %v228_v32 = vld [vmem:[%s929_s1] sm:$0xff]  ;;  %p619_p5 = pnand %p618_p3, %p612_p0 }
  0x1f   : > { %283 = vmatprep.subr.mxu0 %v249_v11  ;;  %v261_v33 = vld [vmem:[%s219_s30] sm:$0xff] }
  0x20   : > { %284 = vmatpush1.msra.mxu0 %v248_v12  ;;  %v260_v37 = vld [vmem:[%s930_s2] sm:$0x3] }
  0x21   : > { %285 = vmatprep.subr.mxu0 %v247_v13  ;;  %v266_v39 = vrot.slane %v260_v37, %v265_v36  ;;  %v270_v40 = vrot.slane %v260_v37, %v269_v38  ;;  %v347_v46 = vld [vmem:[%s931_s3] sm:$0xff] }
  0x22   : > { %286 = vmatpush1.msra.mxu0 %v246_v14 }
  0x23   : > { %287 = vmatprep.subr.mxu0 %v245_v15 }
  0x24   : > { %288 = vmatpush1.msra.mxu0 %v244_v16 }
  0x25   : > { %289 = vmatprep.subr.mxu0 %v243_v17 }
  0x26   : > { %290 = vmatpush1.msra.mxu0 %v242_v18 }
  0x27   : > { %291 = vmatprep.subr.mxu0 %v241_v19 }
  0x28   : > { %292 = vmatpush1.msra.mxu0 %v240_v20 }
  0x29   : > { %293 = vmatprep.subr.mxu0 %v239_v21 }
  0x2a   : > { %294 = vmatpush1.msra.mxu0 %v238_v22 }
  0x2b   : > { %295 = vmatprep.subr.mxu0 %v237_v23 }
  0x2c   : > { %296 = vmatpush1.msra.mxu0 %v236_v24 }
  0x2d   : > { %297 = vmatprep.subr.mxu0 %v235_v25 }
  0x2e   : > { %298 = vmatpush1.msra.mxu0 %v234_v26 }
  0x2f   : > { %299 = vmatprep.subr.mxu0 %v233_v27 }
  0x30   : > { %300 = vmatpush1.msra.mxu0 %v232_v28 }
  0x31   : > { %301 = vmatprep.subr.mxu0 %v231_v29 }
  0x32   : > { %302 = vmatpush1.msra.mxu0 %v230_v30 }
  0x33   : > { %303 = vmatprep.subr.mxu0 %v229_v31 }
  0x34   : > { %304 = vmatpush1.msra.mxu0 %v228_v32 }
  0x35   : > { %338 = vmatmul.mubr.f32.vlgmr.msra.gmra.mxu0 %v261_v33 }
  0xf5   : > { %v339_v41 = vpop.f32.mrf.mxu0 }
  0xf6   : > { %v340_v42 = vadd.f32 %v339_v41, %v266_v39 }
  0xf7   : > { %v341_v43 = vpop.f32.mrf.mxu0 }
  0xf8   : > { %v342_v44 = vadd.f32 %v341_v43, %v270_v40  ;;  %547 = vmatpush3.xpose.msra.mxu1 %v340_v42 }
  0xfa   : > { %346 = vst.msk [vmem:[#allocation2 + $0x8] sm:$0xff] %vm345_vm1, %v342_v44 }
  0xfb   : > { %549 = vmatmul.mubr.f32.vlgmr.msra.gmra.mxu1 %v340_v42 }
 0x101   : > { %v354_v51 = vld [vmem:[#allocation2 + $0x8] sm:$0xff] }
 0x1bb   : > { %v421_v47 = vpop.f32.mrf.mxu1 }
 0x1bc   : > { %v422_v48 = vadd.f32 %v421_v47, %v347_v46 }
 0x1bd   : > { %v550_v49 = vpop.f32.mrf.mxu1 }
 0x1be   : > { %v425_v50 = vsel %vm352_vm2, 0.0, %v422_v48 }
 0x1bf   : > { %427 = vrot.lane.b32.xlu0 %v425_v50, %s689_s12 }
 0x231   : > { %v428_v52 = vpop.permute.xlu0 %427 }
 0x232   : > { %v431_v53 = vsel %vm345_vm1, %v354_v51, %v428_v52 }
 0x233   : > { %433 = vst.msk [vmem:[%s215_s22] sm:$0xff] %vm432_vm3, %v431_v53 }
 0x234   : > { %622 = shalt.err (!%p619_p5)
}
 0x235   : > { %s623_s9 = scalar_lea.hbm %s887_s24, 128  ;;  %s627_s12 = scalar_lea.hbm %s932_s4, 256 }
 0x236   : > { %p624_p6 = scmp.ne.s32.totalorder %s887_s24, %s623_s9  ;;  %p628_p10 = scmp.lt.s32.totalorder %s887_s24, %s932_s4 }
 0x237   : > { %p629_p11 = scmp.lt.s32.totalorder %s627_s12, %s623_s9 }
 0x238   : > { %p625_p7 = pnand %p624_p6, %p756_p4 }
 0x239   : > { %p630_p12 = por %p629_p11, %p628_p10 }
 0x23a   : > { %p626_p9 = pneg %p625_p7 }
 0x23c   : > { %p631_p13 = pnand %p630_p12, %p626_p9 }
 0x23e   : > { %634 = shalt.err (!%p631_p13)
}
 0x23f   : > { %551 = dma.vmem_to_hbm [thread:$0]  (%p756_p4), %s450_s26, 128, %s887_s24, %s435_s5  }
 0x240 PF: > { %p557_p0 = scmp.ge.s32.totalorder %s685_s20, 2  ;;  %s461_s21 = sand.u32 1, %s665_s15  }
 0x241   : > { %s462_s22 = scalar_lea.sflag [#allocation4], %s461_s21 }
 0x242   : > { %p554_p1 = pnand %p557_p0, %p763_p8 }
 0x244   : > { %p555_p2 = pneg %p554_p1 }
 0x246   : > { %660 = dma.done.wait (%p555_p2), %s462_s22, 128  }
 0x247   : > { %662 = vsyncadd (%p555_p2), %s462_s22, 4294967168  ;;  %s17_s20 = sadd.s32 1, %s685_s20   ;;  %s935_s15 = smov %s669_s16 }
 0x248   : > { %p14_p3 = scmp.ge.s32.totalorder %s17_s20, 4   ;;  %s936_s16 = smov %s673_s17 }
 0x249   : > { %s937_s17 = smov %s769_s28  ;;  %s938_s18 = smov %s681_s19 }
 0x24a   : > { %s939_s19 = smov %s941_s23  ;;  %16 = sbr.rel (!%p14_p3) target bundleno = 4 (0x4), region = 78 }
 0x24f   :  { %467 = vsyncpa [#allocation4], 1 }
 0x250   :  { %469 = vsyncpa [#allocation4 + $0x1], 1 }

</bundles_post_ra>
